<compile_context>
chip_gen: v7x
topology: tpu7x:2x2x1
jax: 0.10.0
libtpu: 0.0.40
codegen_flags: <defaults>
</compile_context>

<pallas_src>
import functools

import jax
import jax.numpy as jnp
from jax.experimental import pallas as pl
from jax.experimental.pallas import tpu as pltpu


# ---------------------------------------------------------------------------
# Generation-aware knobs
# ---------------------------------------------------------------------------

def _vmem_limit_bytes():
    """~3/4 of physical VMEM, capped at 100 MiB (headroom for compiler scratch)."""
    try:
        cap = int(pltpu.get_tpu_info().vmem_capacity_bytes)
        return min(cap * 3 // 4, 100 * 1024 * 1024)
    except Exception:  # query unavailable: conservative (v7x-safe) default
        return 48 * 1024 * 1024


_VMEM_LIMIT_BYTES = _vmem_limit_bytes()
# Bigger dst tiles amortize the per-grid-step overhead on 128 MiB parts
# (v5e/v6e); keep 256 when the limit indicates a 64 MiB part (v7x).
_DEFAULT_TILE_DST = 512 if _VMEM_LIMIT_BYTES >= (80 << 20) else 256


def _mosaic_params(*semantics):
    return pltpu.CompilerParams(dimension_semantics=semantics,
                                vmem_limit_bytes=_VMEM_LIMIT_BYTES)


def _resident_spec(block_shape, index_map, buffer_count):
    """BlockSpec for a grid-invariant input. buffer_count=1 halves its VMEM
    footprint (its block index never changes, double-buffering is pure waste)."""
    if buffer_count == 1:
        try:
            return pl.BlockSpec(block_shape, index_map,
                                pipeline_mode=pl.Buffered(buffer_count=1))
        except (TypeError, AttributeError):
            pass
    return pl.BlockSpec(block_shape, index_map)


def _call_resident_fallback(make_call, *args):
    """Run with single-buffered grid-invariant inputs; if this jax/Mosaic build
    rejects Buffered(1), retry with default double-buffering."""
    try:
        return make_call(1)(*args)
    except Exception:
        return make_call(2)(*args)


def _pick_tile(dim, target, quantum):
    """Largest tile <= target that divides `dim` and respects the layout quantum."""
    if dim <= target:
        return dim
    t = (target // quantum) * quantum
    while t >= quantum:
        if dim % t == 0:
            return t
        t -= quantum
    # TODO(synk): pad awkward huge dims instead of one giant block (not hit here).
    return dim


def _dst_tiling(n, target, quantum):
    """(tile, padded_n) for the destination-row axis; pads to a tile multiple
    instead of falling back to a full-extent block."""
    if n <= target:
        return n, n
    t = max(quantum, (target // quantum) * quantum)
    n_pad = ((n + t - 1) // t) * t
    return t, n_pad


# ---------------------------------------------------------------------------
# Tiled matmul (projection): accumulator pattern, bf16 MXU operands, f32 acc.
# ---------------------------------------------------------------------------

def _matmul_kernel(x_ref, w_ref, o_ref, acc_ref):
    @pl.when(pl.program_id(2) == 0)
    def _():
        acc_ref[...] = jnp.zeros_like(acc_ref)

    acc_ref[...] += jnp.dot(x_ref[...], w_ref[...],
                            preferred_element_type=jnp.float32)

    @pl.when(pl.program_id(2) == pl.num_programs(2) - 1)
    def _():
        o_ref[...] = acc_ref[...]


def matmul(x, w, *, tm=256, tn=256, tk=512):
    x = x.astype(jnp.bfloat16)          # MXU-native on v5e/v6e/v7x
    w = w.astype(jnp.bfloat16)
    m, k = x.shape
    _, n = w.shape
    tm = _pick_tile(m, tm, 16)          # bf16 sublane quantum
    tn = _pick_tile(n, tn, 128)
    tk = _pick_tile(k, tk, 128)
    return pl.pallas_call(
        _matmul_kernel,
        out_shape=jax.ShapeDtypeStruct((m, n), jnp.float32),
        grid_spec=pltpu.PrefetchScalarGridSpec(
            num_scalar_prefetch=0,
            grid=(m // tm, n // tn, k // tk),
            in_specs=[pl.BlockSpec((tm, tk), lambda i, j, kk: (i, kk)),
                      pl.BlockSpec((tk, tn), lambda i, j, kk: (kk, j))],
            out_specs=pl.BlockSpec((tm, tn), lambda i, j, kk: (i, j)),
            scratch_shapes=[pltpu.VMEM((tm, tn), jnp.float32)]),
        compiler_params=_mosaic_params("parallel", "parallel", "arbitrary"),
    )(x, w)


# ---------------------------------------------------------------------------
# SAGEConv('mean'), restructured as adj @ (h @ W_neigh), dst-row tiled.
# ---------------------------------------------------------------------------

def _sage_kernel(adj_ref, hwn_ref, hws_ref, deg_ref, b_ref, o_ref, *, apply_elu):
    # Neighbor mean at width f_out: (adj @ (h @ W_neigh)) / deg
    agg = jnp.dot(adj_ref[...], hwn_ref[...],
                  preferred_element_type=jnp.float32)          # (T, F_out)
    inv_deg = 1.0 / jnp.maximum(deg_ref[...], 1.0)             # 0 in-degree -> 0 term
    out = agg * inv_deg + hws_ref[...] + b_ref[...]
    if apply_elu:
        out = jnp.where(out > 0, out, jnp.expm1(jnp.minimum(out, 0.0)))
    o_ref[...] = out


def sage_conv(adj, h, w_self, w_neigh, bias, *, apply_elu, tile_dst=None):
    n_dst, n_src = adj.shape
    f_out = w_self.shape[1]

    # One fused projection of the node features for both terms.
    hw = matmul(h, jnp.concatenate([w_neigh, w_self], axis=1))  # (N, 2*F_out) f32
    hwn = hw[:, :f_out].astype(jnp.bfloat16)   # neighbor part: bf16 ONCE, resident
    hws = hw[:, f_out:]                        # self part: streamed per dst tile
    deg = jnp.sum(adj, axis=1, keepdims=True)  # in-degree, precomputed once
    adj_bf16 = adj.astype(jnp.bfloat16)        # 0/1 exact in bf16; MXU operand

    t, n_pad = _dst_tiling(n_dst, tile_dst or _DEFAULT_TILE_DST, 16)
    pad = n_pad - n_dst
    if pad:
        adj_bf16 = jnp.pad(adj_bf16, ((0, pad), (0, 0)))
        hws = jnp.pad(hws, ((0, pad), (0, 0)))
        deg = jnp.pad(deg, ((0, pad), (0, 0)))

    kernel = functools.partial(_sage_kernel, apply_elu=apply_elu)

    def make_call(bc):
        return pl.pallas_call(
            kernel,
            out_shape=jax.ShapeDtypeStruct((n_pad, f_out), jnp.float32),
            grid_spec=pltpu.PrefetchScalarGridSpec(
                num_scalar_prefetch=0,
                grid=(n_pad // t,),
                in_specs=[
                    pl.BlockSpec((t, n_src), lambda i: (i, 0)),        # adj (bf16)
                    _resident_spec((n_src, f_out), lambda i: (0, 0), bc),  # h@W_neigh
                    pl.BlockSpec((t, f_out), lambda i: (i, 0)),        # h@W_self tile
                    pl.BlockSpec((t, 1), lambda i: (i, 0)),            # in-degree tile
                    _resident_spec((1, f_out), lambda i: (0, 0), bc),  # bias
                ],
                out_specs=pl.BlockSpec((t, f_out), lambda i: (i, 0)),
            ),
            compiler_params=_mosaic_params("parallel"),
        )

    out = _call_resident_fallback(make_call, adj_bf16, hwn, hws, deg, bias)
    return out[:n_dst] if pad else out


# ---------------------------------------------------------------------------
# GATConv attention (DGL semantics), dst-row tiled. el/er are precomputed
# matmul columns; residual + bias + ELU fused; per-head results accumulate
# into a VMEM scratch (no concatenate).
# ---------------------------------------------------------------------------

def _gat_kernel(adj_ref, z_ref, elT_ref, er_ref, res_ref, b_ref, o_ref, acc_ref,
                *, heads, d, neg_slope, apply_elu):
    # Head-invariant mask work, hoisted out of the head loop.
    adjf = adj_ref[...].astype(jnp.float32)             # int8 0/1 -> f32
    mask_bias = (adjf - 1.0) * 1e30                     # 0 (edge) or -1e30 (no edge)
    row_valid = jnp.max(adjf, axis=-1, keepdims=True)   # (T,1) in {0,1}

    for h in range(heads):                               # static unroll (small H)
        el = elT_ref[h:h + 1, :]                         # (1, S) source scores
        er = er_ref[:, h:h + 1]                          # (T, 1) dest scores
        e = er + el                                      # (T, S)
        e = jnp.maximum(e, neg_slope * e) + mask_bias    # leaky_relu(0.2) + mask
        m = jnp.max(e, axis=-1, keepdims=True)
        p = jnp.exp(e - m)                               # masked entries -> exactly 0
        denom = jnp.sum(p, axis=-1, keepdims=True)       # >= 1 for valid rows
        acc = jnp.dot(p.astype(jnp.bfloat16), z_ref[:, h * d:(h + 1) * d],
                      preferred_element_type=jnp.float32)            # (T, D) bf16 MXU
        inv = pl.reciprocal(denom, approx=True) * row_valid          # EUP; 0 if no edges
        acc_ref[:, h * d:(h + 1) * d] = acc * inv

    out = acc_ref[...] + res_ref[...] + b_ref[...]        # residual + bias fused
    if apply_elu:
        out = jnp.where(out > 0, out, jnp.expm1(jnp.minimum(out, 0.0)))
    o_ref[...] = out                                      # single lane-dense store


def gat_layer(adj, h, p, *, apply_elu, tile_dst=None):
    n, f_in = h.shape
    heads, d = p["heads"], p["out_dim"]
    hd = heads * d

    # Fold attention vectors (and the residual projection, if any) into ONE
    # matmul: big = h @ [W | w_l | w_r | (W_res)]
    W = p["fc"]                                         # (F_in, H*D)
    Wr = W.reshape(f_in, heads, d)
    w_l = jnp.einsum("fhd,hd->fh", Wr, p["attn_l"])     # (F_in, H)
    w_r = jnp.einsum("fhd,hd->fh", Wr, p["attn_r"])     # (F_in, H)
    parts = [W, w_l, w_r]
    has_res_fc = "res_fc" in p
    if has_res_fc:
        parts.append(p["res_fc"])
    big = matmul(h, jnp.concatenate(parts, axis=1))     # (N, HD + 2H (+ HD)) f32

    z = big[:, :hd].astype(jnp.bfloat16)                # bf16 ONCE (resident MXU operand)
    elT = jnp.transpose(big[:, hd:hd + heads])          # (H, N) -- tiny, resident
    er = big[:, hd + heads:hd + 2 * heads]              # (N, H) dst scores
    res = big[:, hd + 2 * heads:] if has_res_fc else h  # identity residual OK
    adj_i8 = adj.astype(jnp.int8)                       # mask only; never hits the MXU

    t, n_pad = _dst_tiling(n, tile_dst or _DEFAULT_TILE_DST, 32)
    pad = n_pad - n
    if pad:
        adj_i8 = jnp.pad(adj_i8, ((0, pad), (0, 0)))
        er = jnp.pad(er, ((0, pad), (0, 0)))
        res = jnp.pad(res, ((0, pad), (0, 0)))

    kernel = functools.partial(_gat_kernel, heads=heads, d=d,
                               neg_slope=0.2, apply_elu=apply_elu)

    def make_call(bc):
        return pl.pallas_call(
            kernel,
            out_shape=jax.ShapeDtypeStruct((n_pad, hd), jnp.float32),
            grid_spec=pltpu.PrefetchScalarGridSpec(
                num_scalar_prefetch=0,
                grid=(n_pad // t,),
                in_specs=[
                    pl.BlockSpec((t, n), lambda i: (i, 0)),            # adj (int8)
                    _resident_spec((n, hd), lambda i: (0, 0), bc),     # z (bf16)
                    _resident_spec((heads, n), lambda i: (0, 0), bc),  # el^T
                    pl.BlockSpec((t, heads), lambda i: (i, 0)),        # er dst tile
                    pl.BlockSpec((t, hd), lambda i: (i, 0)),           # residual tile
                    _resident_spec((1, hd), lambda i: (0, 0), bc),     # bias
                ],
                out_specs=pl.BlockSpec((t, hd), lambda i: (i, 0)),
                scratch_shapes=[pltpu.VMEM((t, hd), jnp.float32)]),
            compiler_params=_mosaic_params("parallel"),
        )

    out = _call_resident_fallback(make_call, adj_i8, z, elT, er, res, p["bias"])
    return out[:n] if pad else out


# ---------------------------------------------------------------------------
# GAT model (glue in plain JAX; hot paths above in Pallas)
# ---------------------------------------------------------------------------

def init_gat_params(key, in_feats, n_hidden, n_classes, n_layers, n_heads):
    assert len(n_heads) == n_layers and n_heads[-1] == 1
    params = []
    keys = jax.random.split(key, 4 * n_layers)
    for i in range(n_layers):
        in_dim = in_feats if i == 0 else n_hidden * n_heads[i - 1]
        out_dim = n_classes if i == n_layers - 1 else n_hidden
        h = n_heads[i]
        k0, k1, k2, k3 = keys[4 * i:4 * i + 4]
        if i == 0:
            # SAGEConv(in_dim, out_dim * heads, 'mean')
            f_out = out_dim * h
            params.append(dict(
                kind="sage",
                w_self=0.1 * jax.random.normal(k0, (in_dim, f_out), jnp.float32),
                w_neigh=0.1 * jax.random.normal(k1, (in_dim, f_out), jnp.float32),
                bias=0.1 * jax.random.normal(k2, (1, f_out), jnp.float32),
            ))
        else:
            # GATConv(in_dim, out_dim, heads, residual=True)
            p = dict(
                kind="gat",
                heads=h,
                out_dim=out_dim,
                fc=0.1 * jax.random.normal(k0, (in_dim, h * out_dim), jnp.float32),
                attn_l=0.1 * jax.random.normal(k1, (h, out_dim), jnp.float32),
                attn_r=0.1 * jax.random.normal(k2, (h, out_dim), jnp.float32),
                bias=0.1 * jax.random.normal(k3, (1, h * out_dim), jnp.float32),
            )
            if in_dim != h * out_dim:
                kr = jax.random.fold_in(k3, 7)
                p["res_fc"] = 0.1 * jax.random.normal(
                    kr, (in_dim, h * out_dim), jnp.float32)
            params.append(p)
    return params


def gat_forward(params, adjs, x):
    n_layers = len(params)
    h = x
    for i, (p, adj) in enumerate(zip(params, adjs)):
        last = i == n_layers - 1
        if p["kind"] == "sage":
            h = sage_conv(adj, h, p["w_self"], p["w_neigh"], p["bias"],
                          apply_elu=not last)
        else:
            h = gat_layer(adj, h, p, apply_elu=not last)
            if last and p["heads"] > 1:
                h = h.reshape(h.shape[0], p["heads"], p["out_dim"]).mean(axis=1)
            # last layer has heads == 1, so mean over heads is the identity
        # dropout / feat_drop / attn_drop: identity (eval mode)
        # flatten(1): output is already emitted lane-dense as (N, H*D)
    return h


# ---------------------------------------------------------------------------
if __name__ == "__main__":
    # Small synthetic problem: 16 nodes, 3-layer GAT, heads = [2, 2, 1]
    N = 16
    in_feats, n_hidden, n_classes = 8, 8, 4
    n_layers, n_heads = 3, [2, 2, 1]

    key = jax.random.PRNGKey(0)
    k_x, k_p, k_a = jax.random.split(key, 3)

    x = jax.random.normal(k_x, (N, in_feats), jnp.float32)

    # One dense adjacency ("block") per layer; A[v,u]=1 iff edge u->v.
    adj_keys = jax.random.split(k_a, n_layers)
    adjs = [jax.random.bernoulli(adj_keys[i], 0.3, (N, N)).astype(jnp.float32)
            for i in range(n_layers)]

    params = init_gat_params(k_p, in_feats, n_hidden, n_classes,
                             n_layers, n_heads)

    out = gat_forward(params, adjs, x)
    out = jax.block_until_ready(out)
    assert out.shape == (N, n_classes), out.shape
    assert jnp.all(jnp.isfinite(out))
    print("KERNEL_OK")
</pallas_src>

<mosaic_0001>
module attributes {stable_mosaic.version = 11 : i64} {
  func.func @_matmul_kernel(%arg0: i32, %arg1: i32, %arg2: i32, %arg3: memref<16x8xbf16, #tpu.memory_space<vmem>>, %arg4: memref<8x32xbf16, #tpu.memory_space<vmem>>, %arg5: memref<16x32xf32, #tpu.memory_space<vmem>>, %arg6: memref<16x32xf32, #tpu.memory_space<vmem>>) attributes {dimension_semantics = [#tpu.dimension_semantics<parallel>, #tpu.dimension_semantics<parallel>, #tpu.dimension_semantics<arbitrary>], iteration_bounds = array<i64: 1, 1, 1>, scalar_prefetch = 0 : i64, scratch_operands = 1 : i64, tpu.core_type = #tpu.core_type<tc>, window_params = [{transform_indices = @transform_0, window_bounds = array<i64: 16, 8>}, {transform_indices = @transform_1, window_bounds = array<i64: 8, 32>}, {transform_indices = @transform_2, window_bounds = array<i64: 16, 32>}]} {
    %c0_i32 = arith.constant 0 : i32
    %0 = arith.cmpi eq, %arg2, %c0_i32 : i32
    %1 = arith.extui %0 : i1 to i32
    %c0_i32_0 = arith.constant 0 : i32
    %2 = arith.cmpi ne, %1, %c0_i32_0 : i32
    scf.if %2 {
      %cst_10 = arith.constant 0.000000e+00 : f32
      %12 = vector.broadcast %cst_10 : f32 to vector<16x32xf32>
      %c0_11 = arith.constant 0 : index
      %c0_12 = arith.constant 0 : index
      %13 = vector.load %arg6[%c0_11, %c0_12] : memref<16x32xf32, #tpu.memory_space<vmem>>, vector<16x32xf32>
      tpu.vector_store %arg6[%c0_11, %c0_12], %12 {strides = array<i32>} : memref<16x32xf32, #tpu.memory_space<vmem>>, vector<16x32xf32>,
    } else {
    }
    %c0 = arith.constant 0 : index
    %c0_1 = arith.constant 0 : index
    %3 = vector.load %arg6[%c0, %c0_1] : memref<16x32xf32, #tpu.memory_space<vmem>>, vector<16x32xf32>
    %c0_2 = arith.constant 0 : index
    %c0_3 = arith.constant 0 : index
    %4 = vector.load %arg3[%c0_2, %c0_3] : memref<16x8xbf16, #tpu.memory_space<vmem>>, vector<16x8xbf16>
    %c0_4 = arith.constant 0 : index
    %c0_5 = arith.constant 0 : index
    %5 = vector.load %arg4[%c0_4, %c0_5] : memref<8x32xbf16, #tpu.memory_space<vmem>>, vector<8x32xbf16>
    %cst = arith.constant dense<0.000000e+00> : vector<16x32xf32>
    %6 = tpu.matmul %4, %5, %cst {dimension_numbers = #tpu.dot_dimension_numbers<[1], [0], [0], [1], [0, 0, 1, 1], [], []>} : vector<16x8xbf16>, vector<8x32xbf16>, vector<16x32xf32> -> vector<16x32xf32>
    %7 = arith.addf %3, %6 : vector<16x32xf32>
    %c0_6 = arith.constant 0 : index
    %c0_7 = arith.constant 0 : index
    %8 = vector.load %arg6[%c0_6, %c0_7] : memref<16x32xf32, #tpu.memory_space<vmem>>, vector<16x32xf32>
    tpu.vector_store %arg6[%c0_6, %c0_7], %7 {strides = array<i32>} : memref<16x32xf32, #tpu.memory_space<vmem>>, vector<16x32xf32>,
    %c0_i32_8 = arith.constant 0 : i32
    %9 = arith.cmpi eq, %arg2, %c0_i32_8 : i32
    %10 = arith.extui %9 : i1 to i32
    %c0_i32_9 = arith.constant 0 : i32
    %11 = arith.cmpi ne, %10, %c0_i32_9 : i32
    scf.if %11 {
      %c0_10 = arith.constant 0 : index
      %c0_11 = arith.constant 0 : index
      %12 = vector.load %arg6[%c0_10, %c0_11] : memref<16x32xf32, #tpu.memory_space<vmem>>, vector<16x32xf32>
      %c0_12 = arith.constant 0 : index
      %c0_13 = arith.constant 0 : index
      %13 = vector.load %arg5[%c0_12, %c0_13] : memref<16x32xf32, #tpu.memory_space<vmem>>, vector<16x32xf32>
      tpu.vector_store %arg5[%c0_12, %c0_13], %12 {strides = array<i32>} : memref<16x32xf32, #tpu.memory_space<vmem>>, vector<16x32xf32>,
    } else {
    }
    return
  }
  func.func @transform_0(%arg0: i32, %arg1: i32, %arg2: i32) -> (i32, i32) {
    %c0_i32 = arith.constant 0 : i32
    return %arg0, %arg2 : i32, i32
  }
  func.func @transform_1(%arg0: i32, %arg1: i32, %arg2: i32) -> (i32, i32) {
    %c0_i32 = arith.constant 0 : i32
    return %arg2, %arg1 : i32, i32
  }
  func.func @transform_2(%arg0: i32, %arg1: i32, %arg2: i32) -> (i32, i32) {
    %c0_i32 = arith.constant 0 : i32
    return %arg0, %arg1 : i32, i32
  }
}

</mosaic_0001>

<bundles_post_ra>
// kernel: tpu_custom_call.1
= control target key start
LH: loop header
LB: loop body
LE: loop exit
PB: predicated region body
PF: predicated region fallthrough
CT: control target
= control target key end

     0   :  { %vm17_vm0 = vcmask 261120   ;;  %vm34_vm1 = vcmask 1043456   ;;  %v147_v1 = vmov 0.0   ;;  %vm148_vm2 = vmmov 0   ;;  %s191_s0 = inlined_call_operand.vmem [shape: bf16[16,8], index: 0, kind: input, shape index: {}]   ;;  %s192_s1 = inlined_call_operand.vmem [shape: bf16[8,32], index: 1, kind: input, shape index: {}]   ;;  %s193_s2 = inlined_call_operand.hbm [shape: f32[16,32], index: 2, kind: output, shape index: {}]  }
   0x1   :  { %v24_v0 = vld [vmem:[%s192_s1] sm:$0xf]  ;;  %18 = vst.msk [vmem:[#allocation2] sm:$0xff] %vm17_vm0, %v147_v1  ;;  %19 = vst.msk [vmem:[#allocation2 + $0x8] sm:$0xff] %vm17_vm0, %v147_v1  ;;  %111 = vmatprep.subr.bf16.mxu0 %v147_v1  ;;  %113 = vmatprep.mubr.msk.bf16.mxu0 %vm148_vm2, %v147_v1  ;;  %vm30_vm3 = vcmask 64512  }
   0x2   :  { %v36_v2 = vsel %vm34_vm1, %v24_v0, 0  ;;  %v122_v3 = vld [vmem:[%s191_s0] sm:$0xff]  }
   0x3   :  { %112 = vmatpush3.bf16.msra.mxu0 %v36_v2 }
   0x4   :  { %7 = vsyncpa [#allocation4], 0  ;;  %s149_s1 = smov [#allocation3]  }
   0x5   :  { %s96_s13 = sshll.u32 %s149_s1, 4  ;;  %s97_s13 = int_to_ptr.vmem [resolvable:$true] %s96_s13 }
   0x6   :  { %114 = vmatmul.mubr.msk.bf16.vlgmr.msra.gmra.mrb[0].mxu0 %vm30_vm3, %v122_v3  ;;  %s123_s0 = scalar_lea.vmem %s97_s13, 256  ;;  %p128_p1 = scmp.lt.s32.totalorder %s97_s13, %s97_s13 }
   0x7   :  { %p124_p0 = scmp.ne.s32.totalorder %s97_s13, %s123_s0  ;;  %p129_p2 = scmp.lt.s32.totalorder %s123_s0, %s123_s0 }
   0x8   :  { %v20_v4 = vld [vmem:[#allocation2] sm:$0xff]  ;;  %v21_v6 = vld [vmem:[#allocation2 + $0x8] sm:$0xff] }
   0x9   :  { %p130_p3 = por %p129_p2, %p128_p1 }
   0xb   :  { %p131_p4 = pnand %p130_p3, %p124_p0 }
  0xd9   :  { %v72_v5 = vpop.f32.mrb[0].mxu0 }
  0xda   :  { %v79_v7 = vadd.f32 %v72_v5, %v20_v4  ;;  %v115_v8 = vpop.f32.mrb[1].mxu0 }
  0xdb   :  { %v75_v9 = vpop.f32.mrb[2].mxu0 }
  0xdc   :  { %82 = vst.msk [vmem:[#allocation2] sm:$0xff] %vm17_vm0, %v79_v7  ;;  %v80_v10 = vadd.f32 %v75_v9, %v21_v6  ;;  %v116_v11 = vpop.f32.mrb[3].mxu0 }
  0xde   :  { %83 = vst.msk [vmem:[#allocation2 + $0x8] sm:$0xff] %vm17_vm0, %v80_v10 }
  0xe3   :  { %v87_v12 = vld [vmem:[#allocation2] sm:$0xff] }
  0xe4   :  { %89 = vst.msk [vmem:[#allocation3] sm:$0xff] %vm17_vm0, %v87_v12 }
  0xe5   :  { %v88_v13 = vld [vmem:[#allocation2 + $0x8] sm:$0xff] }
  0xe6   :  { %90 = vst.msk [vmem:[#allocation3 + $0x8] sm:$0xff] %vm17_vm0, %v88_v13 }
  0xe7   :  { %134 = shalt.err (!%p131_p4)
}
  0xe8   :  { %s135_s16 = scalar_lea.hbm %s193_s2, 256 }
  0xe9   :  { %p136_p5 = scmp.ne.s32.totalorder %s193_s2, %s135_s16  ;;  %p139_p6 = scmp.lt.u32.totalorder %s135_s16, %s193_s2 }
  0xeb   :  { %p141_p7 = pnand %p139_p6, %p136_p5 }
  0xed   :  { %144 = shalt.err (!%p141_p7)
}
  0xee   :  { %s150_s21 = smov 128   ;;  %s151_s22 = smov 8  }
  0xef   :  { %102 = dma.vmem_to_hbm [thread:$0]  %s97_s13, 256, %s193_s2, [#allocation4], %s150_s21, %s150_s21, %s151_s22  }
  0xf0   :  { %145 = dma.done.wait [#allocation4], 256  }
  0xf1   :  { %146 = vsyncadd [#allocation4], 4294967040 }
  0xf2   :  { %106 = vsyncpa [#allocation4], 1 }

</bundles_post_ra>
